<compile_context>
chip_gen: v6e
topology: v6e:2x2x1
jax: 0.10.0
libtpu: 0.0.40
codegen_flags: <defaults>
</compile_context>

<pallas_src>
import functools

import jax
import jax.numpy as jnp
from jax.experimental import pallas as pl
from jax.experimental.pallas import tpu as pltpu


def mlp_kernel(x_ref, mask_ref, w1_ref, b1_ref, w2_ref, b2_ref, o_ref, *, inv_keep):
    # Input dropout: keep-mask is int8 (1 byte/elem of HBM traffic); the 1/(1-p)
    # scale is a folded compile-time constant.
    x = jnp.where(mask_ref[...] != 0, x_ref[...] * inv_keep, 0.0)

    # fc1 + ReLU: bf16 MXU operands, f32 accumulation.
    h = jnp.dot(x.astype(jnp.bfloat16), w1_ref[...],
                preferred_element_type=jnp.float32)
    h = jnp.maximum(h + b1_ref[...], 0.0)                 # (TM, hid) + (1, hid)

    # fc2
    y = jnp.dot(h.astype(jnp.bfloat16), w2_ref[...],
                preferred_element_type=jnp.float32)
    o_ref[...] = (y + b2_ref[...]).astype(o_ref.dtype)


def _round_up(n, m):
    return ((n + m - 1) // m) * m


def _pad2d(a, rows, cols):
    pr, pc = rows - a.shape[0], cols - a.shape[1]
    if pr == 0 and pc == 0:
        return a
    return jnp.pad(a, ((0, pr), (0, pc)))


def _choose_tm(B):
    """Batch tile: multiple of 8 sublanes; >=2 grid programs when B allows it
    (v7x dual-TC sharding of the "parallel" axis); minimal padding waste with a
    preference for MXU-row-friendly tiles."""
    B8 = _round_up(B, 8)
    if B8 <= 16:
        return B8                                   # tiny batch: single tile
    half = _round_up(-(-B // 2), 8)                 # ~B/2 -> at least 2 programs
    cands = [tm for tm in (512, 256, 128) if tm <= half]
    if not cands:
        return half                                 # small batch: two ~B/2 tiles
    # minimize padded rows; ties -> larger tile (fewer grid steps, bigger DMAs)
    return min(cands, key=lambda tm: (_round_up(B, tm) - B, -tm))


def _vmem_limit_bytes(TM, in_p, hid_p, out_p):
    """Working-set estimate + headroom, capped below physical VMEM so the compiler
    keeps room for internal scratch (v7x only has 64 MiB per TensorCore)."""
    weights = in_p * hid_p * 2 + hid_p * out_p * 2 + hid_p * 4 + out_p * 4
    streams = 2 * TM * in_p * (4 + 1) + 2 * TM * out_p * 4      # dbl-buffered x/mask/out
    interm = TM * (hid_p * 4 + hid_p * 2 + in_p * 2 + out_p * 4)  # h, bf16 casts, y
    need = int((2 * weights + streams + interm) * 1.5) + (4 << 20)
    try:
        cap = int(pltpu.get_tpu_info().vmem_capacity_bytes)
    except Exception:
        cap = 64 << 20                                          # conservative (v7x)
    return max(min(need, (cap * 3) // 4), 8 << 20)


def _weight_specs(in_p, hid_p, out_p, single_buffer):
    """Grid-invariant (VMEM-resident) operands; single-buffered when supported."""
    def const(shape):
        if single_buffer and hasattr(pl, "Buffered"):
            try:
                return pl.BlockSpec(shape, lambda i: (0, 0),
                                    pipeline_mode=pl.Buffered(buffer_count=1))
            except TypeError:
                pass
        return pl.BlockSpec(shape, lambda i: (0, 0))
    return [const((in_p, hid_p)), const((1, hid_p)),
            const((hid_p, out_p)), const((1, out_p))]


def prepare_mlp_params(w1, b1, w2, b2):
    """One-time weight preparation: pad features to lane multiples (128) and cast
    the matmul weights to bf16.  Hoisted out of the per-call path."""
    in_dim, hid_dim = w1.shape
    out_dim = w2.shape[1]
    LANE = 128
    in_p, hid_p, out_p = (_round_up(d, LANE) for d in (in_dim, hid_dim, out_dim))
    w1_p = _pad2d(w1.astype(jnp.float32), in_p, hid_p).astype(jnp.bfloat16)
    w2_p = _pad2d(w2.astype(jnp.float32), hid_p, out_p).astype(jnp.bfloat16)
    b1_p = _pad2d(b1.reshape(1, -1).astype(jnp.float32), 1, hid_p)
    b2_p = _pad2d(b2.reshape(1, -1).astype(jnp.float32), 1, out_p)
    return dict(w1=w1_p, b1=b1_p, w2=w2_p, b2=b2_p,
                dims=(in_dim, hid_dim, out_dim))


def mlp_classifier_forward(x, params, keep_mask, *, p=0.5):
    """Forward of MLPClassifier (training-mode input dropout with prob p).

    x: (B, in_dim) f32; params: output of prepare_mlp_params;
    keep_mask: (B, in_dim) bool, True = keep element (Bernoulli(1-p)).
    """
    assert 0.0 <= p < 1.0, "dropout prob must be in [0, 1)"
    in_dim, hid_dim, out_dim = params["dims"]
    w1_p, b1_p, w2_p, b2_p = params["w1"], params["b1"], params["w2"], params["b2"]
    in_p, hid_p = w1_p.shape
    out_p = w2_p.shape[1]

    B = x.shape[0]
    TM = _choose_tm(B)
    B_p = _round_up(B, TM)
    grid = (B_p // TM,)

    x_p = _pad2d(x.astype(jnp.float32), B_p, in_p)
    mask_p = _pad2d(keep_mask.astype(jnp.int8), B_p, in_p)   # 1 B/elem HBM stream
    inv_keep = float(1.0 / (1.0 - p))

    flops = 2 * B_p * (in_p * hid_p + hid_p * out_p)
    bytes_accessed = (B_p * in_p * 4 + B_p * in_p * 1 +       # x (f32) + mask (int8)
                      in_p * hid_p * 2 + hid_p * out_p * 2 +  # bf16 weights
                      hid_p * 4 + out_p * 4 +                 # biases
                      B_p * out_p * 4)                        # output
    vmem_limit = _vmem_limit_bytes(TM, in_p, hid_p, out_p)

    def run(single_buffer_weights):
        grid_spec = pltpu.PrefetchScalarGridSpec(
            num_scalar_prefetch=0,
            grid=grid,
            in_specs=[
                pl.BlockSpec((TM, in_p), lambda i: (i, 0)),   # x batch tile (f32)
                pl.BlockSpec((TM, in_p), lambda i: (i, 0)),   # keep-mask tile (int8)
                *_weight_specs(in_p, hid_p, out_p, single_buffer_weights),
            ],
            out_specs=pl.BlockSpec((TM, out_p), lambda i: (i, 0)),
        )
        return pl.pallas_call(
            functools.partial(mlp_kernel, inv_keep=inv_keep),
            out_shape=jax.ShapeDtypeStruct((B_p, out_p), jnp.float32),
            grid_spec=grid_spec,
            compiler_params=pltpu.CompilerParams(
                dimension_semantics=("parallel",),   # shard batch tiles across TCs
                vmem_limit_bytes=vmem_limit,
            ),
            cost_estimate=pl.CostEstimate(
                flops=flops, transcendentals=0, bytes_accessed=bytes_accessed),
        )(x_p, mask_p, w1_p, b1_p, w2_p, b2_p)

    try:
        out_padded = run(single_buffer_weights=True)
    except Exception:
        # Fallback for jax versions without pipeline_mode=Buffered lowering support.
        out_padded = run(single_buffer_weights=False)

    return out_padded[:B, :out_dim]


if __name__ == "__main__":
    # Small shapes consistent with MLPClassifier(in_dim, hid_dim, out_dim).
    B, in_dim, hid_dim, out_dim = 8, 32, 32, 16

    key = jax.random.PRNGKey(0)
    kx, kw1, kb1, kw2, kb2, kdrop = jax.random.split(key, 6)

    x = jax.random.normal(kx, (B, in_dim), dtype=jnp.float32)

    # PyTorch-Linear-style uniform init bounds.
    bound1 = 1.0 / (in_dim ** 0.5)
    w1 = jax.random.uniform(kw1, (in_dim, hid_dim), minval=-bound1, maxval=bound1,
                            dtype=jnp.float32)
    b1 = jax.random.uniform(kb1, (hid_dim,), minval=-bound1, maxval=bound1,
                            dtype=jnp.float32)
    bound2 = 1.0 / (hid_dim ** 0.5)
    w2 = jax.random.uniform(kw2, (hid_dim, out_dim), minval=-bound2, maxval=bound2,
                            dtype=jnp.float32)
    b2 = jax.random.uniform(kb2, (out_dim,), minval=-bound2, maxval=bound2,
                            dtype=jnp.float32)

    # Dropout keep mask (p=0.5), training mode as in F.dropout(x, 0.5).
    keep = jax.random.bernoulli(kdrop, 0.5, (B, in_dim))

    params = prepare_mlp_params(w1, b1, w2, b2)       # one-time pad + bf16 cast
    out = mlp_classifier_forward(x, params, keep, p=0.5)
    jax.block_until_ready(out)

    # Pure-JAX f32 reference using the identical dropout mask.
    x_drop = jnp.where(keep, x * 2.0, 0.0)
    ref = jnp.maximum(x_drop @ w1 + b1, 0.0) @ w2 + b2

    assert out.shape == (B, out_dim) and out.dtype == jnp.float32
    assert bool(jnp.all(jnp.isfinite(out)))
    assert float(jnp.max(jnp.abs(out - ref))) < 1e-1   # bf16-MXU tolerance
    print("KERNEL_OK")
</pallas_src>

<mosaic_0001>
module attributes {stable_mosaic.version = 11 : i64} {
  func.func @mlp_kernel(%arg0: i32, %arg1: memref<8x128xf32, #tpu.memory_space<vmem>>, %arg2: memref<8x128xi8, #tpu.memory_space<vmem>>, %arg3: memref<128x128xbf16, #tpu.memory_space<vmem>>, %arg4: memref<1x128xf32, #tpu.memory_space<vmem>>, %arg5: memref<128x128xbf16, #tpu.memory_space<vmem>>, %arg6: memref<1x128xf32, #tpu.memory_space<vmem>>, %arg7: memref<8x128xf32, #tpu.memory_space<vmem>>) attributes {dimension_semantics = [#tpu.dimension_semantics<parallel>], iteration_bounds = array<i64: 1>, scalar_prefetch = 0 : i64, scratch_operands = 0 : i64, tpu.core_type = #tpu.core_type<tc>, window_params = [{transform_indices = @transform_0, window_bounds = array<i64: 8, 128>}, {transform_indices = @transform_1, window_bounds = array<i64: 8, 128>}, {pipeline_mode = #tpu.pipeline_mode<synchronous>, transform_indices = @transform_2, window_bounds = array<i64: 128, 128>}, {pipeline_mode = #tpu.pipeline_mode<synchronous>, transform_indices = @transform_3, window_bounds = array<i64: 1, 128>}, {pipeline_mode = #tpu.pipeline_mode<synchronous>, transform_indices = @transform_4, window_bounds = array<i64: 128, 128>}, {pipeline_mode = #tpu.pipeline_mode<synchronous>, transform_indices = @transform_5, window_bounds = array<i64: 1, 128>}, {transform_indices = @transform_6, window_bounds = array<i64: 8, 128>}]} {
    %c0 = arith.constant 0 : index
    %c0_0 = arith.constant 0 : index
    %0 = vector.load %arg2[%c0, %c0_0] : memref<8x128xi8, #tpu.memory_space<vmem>>, vector<8x128xi8>
    %c0_i8 = arith.constant 0 : i8
    %1 = vector.broadcast %c0_i8 : i8 to vector<8x128xi8>
    %2 = arith.cmpi ne, %0, %1 : vector<8x128xi8>
    %c0_1 = arith.constant 0 : index
    %c0_2 = arith.constant 0 : index
    %3 = vector.load %arg1[%c0_1, %c0_2] : memref<8x128xf32, #tpu.memory_space<vmem>>, vector<8x128xf32>
    %cst = arith.constant 2.000000e+00 : f32
    %4 = vector.broadcast %cst : f32 to vector<8x128xf32>
    %5 = arith.mulf %3, %4 : vector<8x128xf32>
    %cst_3 = arith.constant 0.000000e+00 : f32
    %6 = vector.broadcast %cst_3 : f32 to vector<8x128xf32>
    %7 = arith.select %2, %5, %6 : vector<8x128xi1>, vector<8x128xf32>
    %8 = arith.truncf %7 : vector<8x128xf32> to vector<8x128xbf16>
    %c0_4 = arith.constant 0 : index
    %c0_5 = arith.constant 0 : index
    %9 = vector.load %arg3[%c0_4, %c0_5] : memref<128x128xbf16, #tpu.memory_space<vmem>>, vector<128x128xbf16>
    %cst_6 = arith.constant dense<0.000000e+00> : vector<8x128xf32>
    %10 = tpu.matmul %8, %9, %cst_6 {dimension_numbers = #tpu.dot_dimension_numbers<[1], [0], [0], [1], [0, 0, 1, 1], [], []>} : vector<8x128xbf16>, vector<128x128xbf16>, vector<8x128xf32> -> vector<8x128xf32>
    %c0_7 = arith.constant 0 : index
    %c0_8 = arith.constant 0 : index
    %11 = vector.load %arg4[%c0_7, %c0_8] : memref<1x128xf32, #tpu.memory_space<vmem>>, vector<1x128xf32>
    %12 = vector.broadcast %11 : vector<1x128xf32> to vector<8x128xf32>
    %13 = arith.addf %10, %12 : vector<8x128xf32>
    %cst_9 = arith.constant 0.000000e+00 : f32
    %14 = vector.broadcast %cst_9 : f32 to vector<8x128xf32>
    %15 = arith.maximumf %13, %14 : vector<8x128xf32>
    %16 = arith.truncf %15 : vector<8x128xf32> to vector<8x128xbf16>
    %c0_10 = arith.constant 0 : index
    %c0_11 = arith.constant 0 : index
    %17 = vector.load %arg5[%c0_10, %c0_11] : memref<128x128xbf16, #tpu.memory_space<vmem>>, vector<128x128xbf16>
    %cst_12 = arith.constant dense<0.000000e+00> : vector<8x128xf32>
    %18 = tpu.matmul %16, %17, %cst_12 {dimension_numbers = #tpu.dot_dimension_numbers<[1], [0], [0], [1], [0, 0, 1, 1], [], []>} : vector<8x128xbf16>, vector<128x128xbf16>, vector<8x128xf32> -> vector<8x128xf32>
    %c0_13 = arith.constant 0 : index
    %c0_14 = arith.constant 0 : index
    %19 = vector.load %arg6[%c0_13, %c0_14] : memref<1x128xf32, #tpu.memory_space<vmem>>, vector<1x128xf32>
    %20 = vector.broadcast %19 : vector<1x128xf32> to vector<8x128xf32>
    %21 = arith.addf %18, %20 : vector<8x128xf32>
    %c0_15 = arith.constant 0 : index
    %c0_16 = arith.constant 0 : index
    %22 = vector.load %arg7[%c0_15, %c0_16] : memref<8x128xf32, #tpu.memory_space<vmem>>, vector<8x128xf32>
    tpu.vector_store %arg7[%c0_15, %c0_16], %21 {strides = array<i32>} : memref<8x128xf32, #tpu.memory_space<vmem>>, vector<8x128xf32>,
    return
  }
  func.func @transform_0(%arg0: i32) -> (i32, i32) {
    %c0_i32 = arith.constant 0 : i32
    %c0_i32_0 = arith.constant 0 : i32
    return %arg0, %c0_i32 : i32, i32
  }
  func.func @transform_1(%arg0: i32) -> (i32, i32) {
    %c0_i32 = arith.constant 0 : i32
    %c0_i32_0 = arith.constant 0 : i32
    return %arg0, %c0_i32 : i32, i32
  }
  func.func @transform_2(%arg0: i32) -> (i32, i32) {
    %c0_i32 = arith.constant 0 : i32
    %c0_i32_0 = arith.constant 0 : i32
    %c0_i32_1 = arith.constant 0 : i32
    return %c0_i32, %c0_i32_0 : i32, i32
  }
  func.func @transform_3(%arg0: i32) -> (i32, i32) {
    %c0_i32 = arith.constant 0 : i32
    %c0_i32_0 = arith.constant 0 : i32
    %c0_i32_1 = arith.constant 0 : i32
    return %c0_i32, %c0_i32_0 : i32, i32
  }
  func.func @transform_4(%arg0: i32) -> (i32, i32) {
    %c0_i32 = arith.constant 0 : i32
    %c0_i32_0 = arith.constant 0 : i32
    %c0_i32_1 = arith.constant 0 : i32
    return %c0_i32, %c0_i32_0 : i32, i32
  }
  func.func @transform_5(%arg0: i32) -> (i32, i32) {
    %c0_i32 = arith.constant 0 : i32
    %c0_i32_0 = arith.constant 0 : i32
    %c0_i32_1 = arith.constant 0 : i32
    return %c0_i32, %c0_i32_0 : i32, i32
  }
  func.func @transform_6(%arg0: i32) -> (i32, i32) {
    %c0_i32 = arith.constant 0 : i32
    %c0_i32_0 = arith.constant 0 : i32
    return %arg0, %c0_i32 : i32, i32
  }
}

module attributes {stable_mosaic.version = 11 : i64} {
  func.func @mlp_kernel(%arg0: i32, %arg1: memref<8x128xf32, #tpu.memory_space<vmem>>, %arg2: memref<8x128xi8, #tpu.memory_space<vmem>>, %arg3: memref<128x128xbf16, #tpu.memory_space<vmem>>, %arg4: memref<1x128xf32, #tpu.memory_space<vmem>>, %arg5: memref<128x128xbf16, #tpu.memory_space<vmem>>, %arg6: memref<1x128xf32, #tpu.memory_space<vmem>>, %arg7: memref<8x128xf32, #tpu.memory_space<vmem>>) attributes {dimension_semantics = [#tpu.dimension_semantics<parallel>], iteration_bounds = array<i64: 1>, scalar_prefetch = 0 : i64, scratch_operands = 0 : i64, tpu.core_type = #tpu.core_type<tc>, window_params = [{transform_indices = @transform_0, window_bounds = array<i64: 8, 128>}, {transform_indices = @transform_1, window_bounds = array<i64: 8, 128>}, {pipeline_mode = #tpu.pipeline_mode<synchronous>, transform_indices = @transform_2, window_bounds = array<i64: 128, 128>}, {pipeline_mode = #tpu.pipeline_mode<synchronous>, transform_indices = @transform_3, window_bounds = array<i64: 1, 128>}, {pipeline_mode = #tpu.pipeline_mode<synchronous>, transform_indices = @transform_4, window_bounds = array<i64: 128, 128>}, {pipeline_mode = #tpu.pipeline_mode<synchronous>, transform_indices = @transform_5, window_bounds = array<i64: 1, 128>}, {transform_indices = @transform_6, window_bounds = array<i64: 8, 128>}]} {
    %c0 = arith.constant 0 : index
    %c0_0 = arith.constant 0 : index
    %0 = vector.load %arg2[%c0, %c0_0] : memref<8x128xi8, #tpu.memory_space<vmem>>, vector<8x128xi8>
    %c0_i8 = arith.constant 0 : i8
    %1 = vector.broadcast %c0_i8 : i8 to vector<8x128xi8>
    %2 = arith.cmpi ne, %0, %1 : vector<8x128xi8>
    %c0_1 = arith.constant 0 : index
    %c0_2 = arith.constant 0 : index
    %3 = vector.load %arg1[%c0_1, %c0_2] : memref<8x128xf32, #tpu.memory_space<vmem>>, vector<8x128xf32>
    %cst = arith.constant 2.000000e+00 : f32
    %4 = vector.broadcast %cst : f32 to vector<8x128xf32>
    %5 = arith.mulf %3, %4 : vector<8x128xf32>
    %cst_3 = arith.constant 0.000000e+00 : f32
    %6 = vector.broadcast %cst_3 : f32 to vector<8x128xf32>
    %7 = arith.select %2, %5, %6 : vector<8x128xi1>, vector<8x128xf32>
    %8 = arith.truncf %7 : vector<8x128xf32> to vector<8x128xbf16>
    %c0_4 = arith.constant 0 : index
    %c0_5 = arith.constant 0 : index
    %9 = vector.load %arg3[%c0_4, %c0_5] : memref<128x128xbf16, #tpu.memory_space<vmem>>, vector<128x128xbf16>
    %cst_6 = arith.constant dense<0.000000e+00> : vector<8x128xf32>
    %10 = tpu.matmul %8, %9, %cst_6 {dimension_numbers = #tpu.dot_dimension_numbers<[1], [0], [0], [1], [0, 0, 1, 1], [], []>} : vector<8x128xbf16>, vector<128x128xbf16>, vector<8x128xf32> -> vector<8x128xf32>
    %c0_7 = arith.constant 0 : index
    %c0_8 = arith.constant 0 : index
    %11 = vector.load %arg4[%c0_7, %c0_8] : memref<1x128xf32, #tpu.memory_space<vmem>>, vector<1x128xf32>
    %12 = vector.broadcast %11 : vector<1x128xf32> to vector<8x128xf32>
    %13 = arith.addf %10, %12 : vector<8x128xf32>
    %cst_9 = arith.constant 0.000000e+00 : f32
    %14 = vector.broadcast %cst_9 : f32 to vector<8x128xf32>
    %15 = arith.maximumf %13, %14 : vector<8x128xf32>
    %16 = arith.truncf %15 : vector<8x128xf32> to vector<8x128xbf16>
    %c0_10 = arith.constant 0 : index
    %c0_11 = arith.constant 0 : index
    %17 = vector.load %arg5[%c0_10, %c0_11] : memref<128x128xbf16, #tpu.memory_space<vmem>>, vector<128x128xbf16>
    %cst_12 = arith.constant dense<0.000000e+00> : vector<8x128xf32>
    %18 = tpu.matmul %16, %17, %cst_12 {dimension_numbers = #tpu.dot_dimension_numbers<[1], [0], [0], [1], [0, 0, 1, 1], [], []>} : vector<8x128xbf16>, vector<128x128xbf16>, vector<8x128xf32> -> vector<8x128xf32>
    %c0_13 = arith.constant 0 : index
    %c0_14 = arith.constant 0 : index
    %19 = vector.load %arg6[%c0_13, %c0_14] : memref<1x128xf32, #tpu.memory_space<vmem>>, vector<1x128xf32>
    %20 = vector.broadcast %19 : vector<1x128xf32> to vector<8x128xf32>
    %21 = arith.addf %18, %20 : vector<8x128xf32>
    %c0_15 = arith.constant 0 : index
    %c0_16 = arith.constant 0 : index
    %22 = vector.load %arg7[%c0_15, %c0_16] : memref<8x128xf32, #tpu.memory_space<vmem>>, vector<8x128xf32>
    tpu.vector_store %arg7[%c0_15, %c0_16], %21 {strides = array<i32>} : memref<8x128xf32, #tpu.memory_space<vmem>>, vector<8x128xf32>,
    return
  }
  func.func @transform_0(%arg0: i32) -> (i32, i32) {
    %c0_i32 = arith.constant 0 : i32
    %c0_i32_0 = arith.constant 0 : i32
    return %arg0, %c0_i32 : i32, i32
  }
  func.func @transform_1(%arg0: i32) -> (i32, i32) {
    %c0_i32 = arith.constant 0 : i32
    %c0_i32_0 = arith.constant 0 : i32
    return %arg0, %c0_i32 : i32, i32
  }
  func.func @transform_2(%arg0: i32) -> (i32, i32) {
    %c0_i32 = arith.constant 0 : i32
    %c0_i32_0 = arith.constant 0 : i32
    %c0_i32_1 = arith.constant 0 : i32
    return %c0_i32, %c0_i32_0 : i32, i32
  }
  func.func @transform_3(%arg0: i32) -> (i32, i32) {
    %c0_i32 = arith.constant 0 : i32
    %c0_i32_0 = arith.constant 0 : i32
    %c0_i32_1 = arith.constant 0 : i32
    return %c0_i32, %c0_i32_0 : i32, i32
  }
  func.func @transform_4(%arg0: i32) -> (i32, i32) {
    %c0_i32 = arith.constant 0 : i32
    %c0_i32_0 = arith.constant 0 : i32
    %c0_i32_1 = arith.constant 0 : i32
    return %c0_i32, %c0_i32_0 : i32, i32
  }
  func.func @transform_5(%arg0: i32) -> (i32, i32) {
    %c0_i32 = arith.constant 0 : i32
    %c0_i32_0 = arith.constant 0 : i32
    %c0_i32_1 = arith.constant 0 : i32
    return %c0_i32, %c0_i32_0 : i32, i32
  }
  func.func @transform_6(%arg0: i32) -> (i32, i32) {
    %c0_i32 = arith.constant 0 : i32
    %c0_i32_0 = arith.constant 0 : i32
    return %arg0, %c0_i32 : i32, i32
  }
}

</mosaic_0001>

<bundles_post_ra>
// kernel: tpu_custom_call.1
= control target key start
LH: loop header
LB: loop body
LE: loop exit
PB: predicated region body
PF: predicated region fallthrough
CT: control target
= control target key end

     0   :  { %11 = vsyncpa [#allocation3], 0  ;;  %s608_s0 = inlined_call_operand.hbm [shape: f32[8,128], index: 0, kind: input, shape index: {}]   ;;  %s609_s1 = inlined_call_operand.hbm [shape: s8[8,128], index: 1, kind: input, shape index: {}]   ;;  %s610_s2 = inlined_call_operand.hbm [shape: bf16[128,128], index: 2, kind: input, shape index: {}]   ;;  %s611_s3 = inlined_call_operand.vmem [shape: f32[1,128], index: 3, kind: input, shape index: {}]   ;;  %s612_s4 = inlined_call_operand.hbm [shape: bf16[128,128], index: 4, kind: input, shape index: {}]   ;;  %s613_s5 = inlined_call_operand.vmem [shape: f32[1,128], index: 5, kind: input, shape index: {}]   ;;  %s614_s6 = inlined_call_operand.hbm [shape: f32[8,128], index: 6, kind: output, shape index: {}]  }
   0x1   :  { %12 = vsyncpa [#allocation6], 0 }
   0x2   :  { %13 = vsyncpa [#allocation9], 0 }
   0x3   :  { %14 = vsyncpa [#allocation4], 0  ;;  %s542_s21 = smov [#allocation5]   ;;  %s543_s23 = smov [#allocation2]  }
   0x4   :  { %s31_s22 = sshll.u32 %s542_s21, 4  ;;  %s21_s24 = sshll.u32 %s543_s23, 4  ;;  %s32_s22 = int_to_ptr.vmem [resolvable:$true] %s31_s22  ;;  %s22_s24 = int_to_ptr.vmem [resolvable:$true] %s21_s24 }
   0x5   :  { %s442_s25 = scalar_lea.vmem %s32_s22, 32  ;;  %p447_p1 = scmp.lt.s32.totalorder %s32_s22, %s32_s22 }
   0x6   :  { %p443_p0 = scmp.ne.s32.totalorder %s32_s22, %s442_s25  ;;  %p448_p2 = scmp.lt.s32.totalorder %s442_s25, %s442_s25 }
   0x8   :  { %p449_p3 = por %p448_p2, %p447_p1 }
   0xa   :  { %p450_p4 = pnand %p449_p3, %p443_p0 }
   0xc   :  { %453 = shalt.err (!%p450_p4)
}
   0xd   :  { %34 = dma.hbm_to_vmem [thread:$0]  %s609_s1, 32, %s32_s22, [#allocation6]  }
   0xe   :  { %s462_s28 = scalar_lea.vmem %s22_s24, 128  ;;  %p467_p6 = scmp.lt.s32.totalorder %s22_s24, %s22_s24 }
   0xf   :  { %p463_p5 = scmp.ne.s32.totalorder %s22_s24, %s462_s28  ;;  %p468_p7 = scmp.lt.s32.totalorder %s462_s28, %s462_s28 }
  0x11   :  { %p469_p8 = por %p468_p7, %p467_p6 }
  0x13   :  { %p470_p9 = pnand %p469_p8, %p463_p5 }
  0x15   :  { %473 = shalt.err (!%p470_p9)
}
  0x16   :  { %24 = dma.hbm_to_vmem [thread:$0]  %s608_s0, 128, %s22_s24, [#allocation3]  }
  0x17   :  { %s544_s7 = smov [#allocation7]  }
  0x18   :  { %s40_s8 = sshll.u32 %s544_s7, 4  ;;  %s41_s8 = int_to_ptr.vmem [resolvable:$true] %s40_s8 }
  0x19   :  { %s482_s9 = scalar_lea.vmem %s41_s8, 1024  ;;  %p487_p11 = scmp.lt.s32.totalorder %s41_s8, %s41_s8 }
  0x1a   :  { %p483_p10 = scmp.ne.s32.totalorder %s41_s8, %s482_s9  ;;  %p488_p12 = scmp.lt.s32.totalorder %s482_s9, %s482_s9 }
  0x1c   :  { %p489_p13 = por %p488_p12, %p487_p11 }
  0x1e   :  { %p490_p0 = pnand %p489_p13, %p483_p10 }
  0x20   :  { %493 = shalt.err (!%p490_p0)
}
  0x21   :  { %s545_s1 = smov 64   ;;  %s546_s10 = smov 4  }
  0x22   :  { %46 = dma.hbm_to_vmem [thread:$0]  %s610_s2, 1024, %s41_s8, [#allocation6], %s545_s1, %s545_s1, %s546_s10  }
  0x23   :  { %s547_s13 = smov [#allocation8]  }
  0x24   :  { %s54_s14 = sshll.u32 %s547_s13, 4  ;;  %s55_s14 = int_to_ptr.vmem [resolvable:$true] %s54_s14 }
  0x25   :  { %s502_s0 = scalar_lea.vmem %s55_s14, 1024  ;;  %p507_p2 = scmp.lt.s32.totalorder %s55_s14, %s55_s14 }
  0x26   :  { %p503_p1 = scmp.ne.s32.totalorder %s55_s14, %s502_s0  ;;  %p508_p3 = scmp.lt.s32.totalorder %s502_s0, %s502_s0 }
  0x28   :  { %p509_p4 = por %p508_p3, %p507_p2 }
  0x2a   :  { %p510_p5 = pnand %p509_p4, %p503_p1 }
  0x2c   :  { %513 = shalt.err (!%p510_p5)
}
  0x2d   :  { %60 = dma.hbm_to_vmem [thread:$0]  %s612_s4, 1024, %s55_s14, [#allocation9], %s545_s1, %s545_s1, %s546_s10  }
  0x2e   :  { %534 = dma.done.wait [#allocation3], 128  }
  0x2f   :  { %535 = vsyncadd [#allocation3], 4294967168 }
  0x30   :  { %536 = dma.done.wait [#allocation6], 1056  }
  0x31   :  { %537 = vsyncadd [#allocation6], 4294966240 }
  0x32   :  { %538 = dma.done.wait [#allocation9], 1024  }
  0x33   :  { %539 = vsyncadd [#allocation9], 4294966272  ;;  %v548_v0 = vmov 0.0   ;;  %vm549_vm0 = vmmov 0   ;;  %v418_v1 = vld [vmem:[#allocation7 + $0x38] sm:$0xff]   ;;  %v419_v2 = vld [vmem:[#allocation7 + $0x30] sm:$0xff]  }
  0x34   :  { %368 = vmatprep.subr.bf16.mxu0 %v548_v0  ;;  %384 = vmatprep.mubr.msk.bf16.mxu0 %vm549_vm0, %v548_v0  ;;  %v420_v3 = vld [vmem:[#allocation7 + $0x28] sm:$0xff]   ;;  %v426_v4 = vld [vmem:[#allocation8 + $0x38] sm:$0xff]   ;;  %v421_v5 = vld [vmem:[#allocation7 + $0x20] sm:$0xff]   ;;  %v550_v12 = vmov 0   ;;  %s551_s19 = smov [#allocation10]  }
  0x35   :  { %388 = vmatprep.subr.bf16.mxu1 %v548_v0  ;;  %404 = vmatprep.mubr.msk.bf16.mxu1 %vm549_vm0, %v548_v0  ;;  %v427_v6 = vld [vmem:[#allocation8 + $0x30] sm:$0xff]   ;;  %v422_v7 = vld [vmem:[#allocation7 + $0x18] sm:$0xff]   ;;  %v428_v9 = vld [vmem:[#allocation8 + $0x28] sm:$0xff]   ;;  %s318_s20 = sshll.u32 %s551_s19, 4  ;;  %s319_s20 = int_to_ptr.vmem [resolvable:$true] %s318_s20 }
  0x36   :  { %369 = vmatpush3.bf16.msra.mxu0 %v418_v1  ;;  %389 = vmatpush3.bf16.msra.mxu1 %v426_v4  ;;  %v78_v8 = vld [vmem:[#allocation5] sm:$0x3]  ;;  %v423_v10 = vld [vmem:[#allocation7 + $0x10] sm:$0xff]   ;;  %v429_v11 = vld [vmem:[#allocation8 + $0x20] sm:$0xff]   ;;  %p519_p7 = scmp.lt.s32.totalorder %s319_s20, %s319_s20 }
  0x37   :  { %370 = vmatprep.subr.bf16.mxu0 %v548_v0  ;;  %390 = vmatprep.subr.bf16.mxu1 %v548_v0  ;;  %vm79_vm1 = vnez %v78_v8  ;;  %v424_v14 = vld [vmem:[#allocation7 + $0x8] sm:$0xff]   ;;  %v80_v15 = vld [vmem:[#allocation2] sm:$0xff]  ;;  %v425_v19 = vld [vmem:[#allocation7] sm:$0xff]  }
  0x38   :  { %v82_v13 = vsel %vm79_vm1, 16843009, %v550_v12  ;;  %v430_v17 = vld [vmem:[#allocation8 + $0x18] sm:$0xff]   ;;  %v81_v18 = vmul.f32 2.0, %v80_v15  ;;  %v431_v20 = vld [vmem:[#allocation8 + $0x10] sm:$0xff]   ;;  %v432_v22 = vld [vmem:[#allocation8 + $0x8] sm:$0xff]  }
  0x39   :  { %v83_v16 = vunpack.c.0.s8 %v82_v13  ;;  %v433_v23 = vld [vmem:[#allocation8] sm:$0xff]   ;;  %v329_v24 = vld [vmem:[%s611_s3] ss:$0 sm:$0xff]  ;;  %s514_s3 = scalar_lea.vmem %s319_s20, 128 }
  0x3a   :  { %371 = vmatpush3.bf16.msra.mxu0 %v419_v2  ;;  %391 = vmatpush3.bf16.msra.mxu1 %v427_v6  ;;  %v339_v21 = vpack.c.bf16 %v81_v18, %v81_v18  ;;  %v341_v32 = vld [vmem:[%s613_s5] ss:$0 sm:$0xff]  ;;  %p515_p6 = scmp.ne.s32.totalorder %s319_s20, %s514_s3  ;;  %p520_p8 = scmp.lt.s32.totalorder %s514_s3, %s514_s3 }
  0x3b   :  { %372 = vmatprep.subr.bf16.mxu0 %v548_v0  ;;  %392 = vmatprep.subr.bf16.mxu1 %v548_v0  ;;  %vm84_vm2 = vcmp.ne.s32.totalorder %v83_v16, 0 }
  0x3c   :  { %vm338_vm3 = vmpackc.low %vm84_vm2, %vm84_vm2  ;;  %p521_p9 = por %p520_p8, %p519_p7 }
  0x3e   :  { %373 = vmatpush3.bf16.msra.mxu0 %v420_v3  ;;  %393 = vmatpush3.bf16.msra.mxu1 %v428_v9  ;;  %p522_p10 = pnand %p521_p9, %p515_p6 }
  0x3f   :  { %374 = vmatprep.subr.bf16.mxu0 %v548_v0  ;;  %394 = vmatprep.subr.bf16.mxu1 %v548_v0 }
  0x42   :  { %375 = vmatpush3.bf16.msra.mxu0 %v421_v5  ;;  %395 = vmatpush3.bf16.msra.mxu1 %v429_v11 }
  0x43   :  { %376 = vmatprep.subr.bf16.mxu0 %v548_v0  ;;  %396 = vmatprep.subr.bf16.mxu1 %v548_v0 }
  0x46   :  { %377 = vmatpush3.bf16.msra.mxu0 %v422_v7  ;;  %397 = vmatpush3.bf16.msra.mxu1 %v430_v17 }
  0x47   :  { %378 = vmatprep.subr.bf16.mxu0 %v548_v0  ;;  %398 = vmatprep.subr.bf16.mxu1 %v548_v0 }
  0x4a   :  { %379 = vmatpush3.bf16.msra.mxu0 %v423_v10  ;;  %399 = vmatpush3.bf16.msra.mxu1 %v431_v20 }
  0x4b   :  { %380 = vmatprep.subr.bf16.mxu0 %v548_v0  ;;  %400 = vmatprep.subr.bf16.mxu1 %v548_v0 }
  0x4e   :  { %381 = vmatpush3.bf16.msra.mxu0 %v424_v14  ;;  %401 = vmatpush3.bf16.msra.mxu1 %v432_v22 }
  0x4f   :  { %382 = vmatprep.subr.bf16.mxu0 %v548_v0  ;;  %402 = vmatprep.subr.bf16.mxu1 %v548_v0 }
  0x52   :  { %383 = vmatpush3.bf16.msra.mxu0 %v425_v19  ;;  %403 = vmatpush3.bf16.msra.mxu1 %v433_v23 }
  0x55   :  { %385 = vmatmul.mubr.msk.bf16.vlgmr.msra.gmra.mxu0 %vm338_vm3, %v339_v21 }
 0x115   :  { %v192_v25 = vpop.f32.mrf.mxu0 }
 0x116   :  { %v193_v26 = vadd.f32 %v329_v24, %v192_v25 }
 0x117   :  { %v386_v27 = vpop.f32.mrf.mxu0 }
 0x118   :  { %v198_v28 = vmax.f32 %v193_v26, 0.0 }
 0x119   :  { %v195_v29 = vpop.f32.mrf.mxu0 }
 0x11a   :  { %v199_v30 = vpack.c.bf16 %v198_v28, %v198_v28 }
 0x11b   :  { %v387_v31 = vpop.f32.mrf.mxu0 }
 0x11c   :  { %405 = vmatmul.mubr.bf16.vlgmr.msra.gmra.mxu1 %v199_v30 }
 0x1dc   :  { %v305_v33 = vpop.f32.mrf.mxu1 }
 0x1dd   :  { %v306_v34 = vadd.f32 %v341_v32, %v305_v33 }
 0x1de   :  { %v406_v35 = vpop.f32.mrf.mxu1 }
 0x1df   :  { %311 = vst [vmem:[#allocation10] sm:$0xff] %v306_v34 }
 0x1e0   :  { %v308_v36 = vpop.f32.mrf.mxu1 }
 0x1e1   :  { %525 = shalt.err (!%p522_p10)
}
 0x1e2   :  { %321 = dma.vmem_to_hbm [thread:$0]  %s319_s20, 128, %s614_s6, [#allocation4]   ;;  %v407_v37 = vpop.f32.mrf.mxu1 }
 0x1e3   :  { %540 = dma.done.wait [#allocation4], 128  }
 0x1e4   :  { %541 = vsyncadd [#allocation4], 4294967168 }
 0x1e5   :  { %325 = vsyncpa [#allocation3], 1 }
 0x1e6   :  { %326 = vsyncpa [#allocation6], 1 }
 0x1e7   :  { %327 = vsyncpa [#allocation9], 1 }
 0x1e8   :  { %328 = vsyncpa [#allocation4], 1 }

// kernel: tpu_custom_call.1
= control target key start
LH: loop header
LB: loop body
LE: loop exit
PB: predicated region body
PF: predicated region fallthrough
CT: control target
= control target key end

     0   :  { %11 = vsyncpa [#allocation3], 0  ;;  %s608_s0 = inlined_call_operand.hbm [shape: f32[8,128], index: 0, kind: input, shape index: {}]   ;;  %s609_s1 = inlined_call_operand.hbm [shape: s8[8,128], index: 1, kind: input, shape index: {}]   ;;  %s610_s2 = inlined_call_operand.hbm [shape: bf16[128,128], index: 2, kind: input, shape index: {}]   ;;  %s611_s3 = inlined_call_operand.vmem [shape: f32[1,128], index: 3, kind: input, shape index: {}]   ;;  %s612_s4 = inlined_call_operand.hbm [shape: bf16[128,128], index: 4, kind: input, shape index: {}]   ;;  %s613_s5 = inlined_call_operand.vmem [shape: f32[1,128], index: 5, kind: input, shape index: {}]   ;;  %s614_s6 = inlined_call_operand.hbm [shape: f32[8,128], index: 6, kind: output, shape index: {}]  }
   0x1   :  { %12 = vsyncpa [#allocation6], 0 }
   0x2   :  { %13 = vsyncpa [#allocation9], 0 }
   0x3   :  { %14 = vsyncpa [#allocation4], 0  ;;  %s542_s21 = smov [#allocation5]   ;;  %s543_s23 = smov [#allocation2]  }
   0x4   :  { %s31_s22 = sshll.u32 %s542_s21, 4  ;;  %s21_s24 = sshll.u32 %s543_s23, 4  ;;  %s32_s22 = int_to_ptr.vmem [resolvable:$true] %s31_s22  ;;  %s22_s24 = int_to_ptr.vmem [resolvable:$true] %s21_s24 }
   0x5   :  { %s442_s25 = scalar_lea.vmem %s32_s22, 32  ;;  %p447_p1 = scmp.lt.s32.totalorder %s32_s22, %s32_s22 }
   0x6   :  { %p443_p0 = scmp.ne.s32.totalorder %s32_s22, %s442_s25  ;;  %p448_p2 = scmp.lt.s32.totalorder %s442_s25, %s442_s25 }
   0x8   :  { %p449_p3 = por %p448_p2, %p447_p1 }
   0xa   :  { %p450_p4 = pnand %p449_p3, %p443_p0 }
   0xc   :  { %453 = shalt.err (!%p450_p4)
}
   0xd   :  { %34 = dma.hbm_to_vmem [thread:$0]  %s609_s1, 32, %s32_s22, [#allocation6]  }
   0xe   :  { %s462_s28 = scalar_lea.vmem %s22_s24, 128  ;;  %p467_p6 = scmp.lt.s32.totalorder %s22_s24, %s22_s24 }
   0xf   :  { %p463_p5 = scmp.ne.s32.totalorder %s22_s24, %s462_s28  ;;  %p468_p7 = scmp.lt.s32.totalorder %s462_s28, %s462_s28 }
  0x11   :  { %p469_p8 = por %p468_p7, %p467_p6 }
  0x13   :  { %p470_p9 = pnand %p469_p8, %p463_p5 }
  0x15   :  { %473 = shalt.err (!%p470_p9)
}
  0x16   :  { %24 = dma.hbm_to_vmem [thread:$0]  %s608_s0, 128, %s22_s24, [#allocation3]  }
  0x17   :  { %s544_s7 = smov [#allocation7]  }
  0x18   :  { %s40_s8 = sshll.u32 %s544_s7, 4  ;;  %s41_s8 = int_to_ptr.vmem [resolvable:$true] %s40_s8 }
  0x19   :  { %s482_s9 = scalar_lea.vmem %s41_s8, 1024  ;;  %p487_p11 = scmp.lt.s32.totalorder %s41_s8, %s41_s8 }
  0x1a   :  { %p483_p10 = scmp.ne.s32.totalorder %s41_s8, %s482_s9  ;;  %p488_p12 = scmp.lt.s32.totalorder %s482_s9, %s482_s9 }
  0x1c   :  { %p489_p13 = por %p488_p12, %p487_p11 }
  0x1e   :  { %p490_p0 = pnand %p489_p13, %p483_p10 }
  0x20   :  { %493 = shalt.err (!%p490_p0)
}
  0x21   :  { %s545_s1 = smov 64   ;;  %s546_s10 = smov 4  }
  0x22   :  { %46 = dma.hbm_to_vmem [thread:$0]  %s610_s2, 1024, %s41_s8, [#allocation6], %s545_s1, %s545_s1, %s546_s10  }
  0x23   :  { %s547_s13 = smov [#allocation8]  }
  0x24   :  { %s54_s14 = sshll.u32 %s547_s13, 4  ;;  %s55_s14 = int_to_ptr.vmem [resolvable:$true] %s54_s14 }
  0x25   :  { %s502_s0 = scalar_lea.vmem %s55_s14, 1024  ;;  %p507_p2 = scmp.lt.s32.totalorder %s55_s14, %s55_s14 }
  0x26   :  { %p503_p1 = scmp.ne.s32.totalorder %s55_s14, %s502_s0  ;;  %p508_p3 = scmp.lt.s32.totalorder %s502_s0, %s502_s0 }
  0x28   :  { %p509_p4 = por %p508_p3, %p507_p2 }
  0x2a   :  { %p510_p5 = pnand %p509_p4, %p503_p1 }
  0x2c   :  { %513 = shalt.err (!%p510_p5)
}
  0x2d   :  { %60 = dma.hbm_to_vmem [thread:$0]  %s612_s4, 1024, %s55_s14, [#allocation9], %s545_s1, %s545_s1, %s546_s10  }
  0x2e   :  { %534 = dma.done.wait [#allocation3], 128  }
  0x2f   :  { %535 = vsyncadd [#allocation3], 4294967168 }
  0x30   :  { %536 = dma.done.wait [#allocation6], 1056  }
  0x31   :  { %537 = vsyncadd [#allocation6], 4294966240 }
  0x32   :  { %538 = dma.done.wait [#allocation9], 1024  }
  0x33   :  { %539 = vsyncadd [#allocation9], 4294966272  ;;  %v548_v0 = vmov 0.0   ;;  %vm549_vm0 = vmmov 0   ;;  %v418_v1 = vld [vmem:[#allocation7 + $0x38] sm:$0xff]   ;;  %v419_v2 = vld [vmem:[#allocation7 + $0x30] sm:$0xff]  }
  0x34   :  { %368 = vmatprep.subr.bf16.mxu0 %v548_v0  ;;  %384 = vmatprep.mubr.msk.bf16.mxu0 %vm549_vm0, %v548_v0  ;;  %v420_v3 = vld [vmem:[#allocation7 + $0x28] sm:$0xff]   ;;  %v426_v4 = vld [vmem:[#allocation8 + $0x38] sm:$0xff]   ;;  %v421_v5 = vld [vmem:[#allocation7 + $0x20] sm:$0xff]   ;;  %v550_v12 = vmov 0   ;;  %s551_s19 = smov [#allocation10]  }
  0x35   :  { %388 = vmatprep.subr.bf16.mxu1 %v548_v0  ;;  %404 = vmatprep.mubr.msk.bf16.mxu1 %vm549_vm0, %v548_v0  ;;  %v427_v6 = vld [vmem:[#allocation8 + $0x30] sm:$0xff]   ;;  %v422_v7 = vld [vmem:[#allocation7 + $0x18] sm:$0xff]   ;;  %v428_v9 = vld [vmem:[#allocation8 + $0x28] sm:$0xff]   ;;  %s318_s20 = sshll.u32 %s551_s19, 4  ;;  %s319_s20 = int_to_ptr.vmem [resolvable:$true] %s318_s20 }
  0x36   :  { %369 = vmatpush3.bf16.msra.mxu0 %v418_v1  ;;  %389 = vmatpush3.bf16.msra.mxu1 %v426_v4  ;;  %v78_v8 = vld [vmem:[#allocation5] sm:$0x3]  ;;  %v423_v10 = vld [vmem:[#allocation7 + $0x10] sm:$0xff]   ;;  %v429_v11 = vld [vmem:[#allocation8 + $0x20] sm:$0xff]   ;;  %p519_p7 = scmp.lt.s32.totalorder %s319_s20, %s319_s20 }
  0x37   :  { %370 = vmatprep.subr.bf16.mxu0 %v548_v0  ;;  %390 = vmatprep.subr.bf16.mxu1 %v548_v0  ;;  %vm79_vm1 = vnez %v78_v8  ;;  %v424_v14 = vld [vmem:[#allocation7 + $0x8] sm:$0xff]   ;;  %v80_v15 = vld [vmem:[#allocation2] sm:$0xff]  ;;  %v425_v19 = vld [vmem:[#allocation7] sm:$0xff]  }
  0x38   :  { %v82_v13 = vsel %vm79_vm1, 16843009, %v550_v12  ;;  %v430_v17 = vld [vmem:[#allocation8 + $0x18] sm:$0xff]   ;;  %v81_v18 = vmul.f32 2.0, %v80_v15  ;;  %v431_v20 = vld [vmem:[#allocation8 + $0x10] sm:$0xff]   ;;  %v432_v22 = vld [vmem:[#allocation8 + $0x8] sm:$0xff]  }
  0x39   :  { %v83_v16 = vunpack.c.0.s8 %v82_v13  ;;  %v433_v23 = vld [vmem:[#allocation8] sm:$0xff]   ;;  %v329_v24 = vld [vmem:[%s611_s3] ss:$0 sm:$0xff]  ;;  %s514_s3 = scalar_lea.vmem %s319_s20, 128 }
  0x3a   :  { %371 = vmatpush3.bf16.msra.mxu0 %v419_v2  ;;  %391 = vmatpush3.bf16.msra.mxu1 %v427_v6  ;;  %v339_v21 = vpack.c.bf16 %v81_v18, %v81_v18  ;;  %v341_v32 = vld [vmem:[%s613_s5] ss:$0 sm:$0xff]  ;;  %p515_p6 = scmp.ne.s32.totalorder %s319_s20, %s514_s3  ;;  %p520_p8 = scmp.lt.s32.totalorder %s514_s3, %s514_s3 }
  0x3b   :  { %372 = vmatprep.subr.bf16.mxu0 %v548_v0  ;;  %392 = vmatprep.subr.bf16.mxu1 %v548_v0  ;;  %vm84_vm2 = vcmp.ne.s32.totalorder %v83_v16, 0 }
  0x3c   :  { %vm338_vm3 = vmpackc.low %vm84_vm2, %vm84_vm2  ;;  %p521_p9 = por %p520_p8, %p519_p7 }
  0x3e   :  { %373 = vmatpush3.bf16.msra.mxu0 %v420_v3  ;;  %393 = vmatpush3.bf16.msra.mxu1 %v428_v9  ;;  %p522_p10 = pnand %p521_p9, %p515_p6 }
  0x3f   :  { %374 = vmatprep.subr.bf16.mxu0 %v548_v0  ;;  %394 = vmatprep.subr.bf16.mxu1 %v548_v0 }
  0x42   :  { %375 = vmatpush3.bf16.msra.mxu0 %v421_v5  ;;  %395 = vmatpush3.bf16.msra.mxu1 %v429_v11 }
  0x43   :  { %376 = vmatprep.subr.bf16.mxu0 %v548_v0  ;;  %396 = vmatprep.subr.bf16.mxu1 %v548_v0 }
  0x46   :  { %377 = vmatpush3.bf16.msra.mxu0 %v422_v7  ;;  %397 = vmatpush3.bf16.msra.mxu1 %v430_v17 }
  0x47   :  { %378 = vmatprep.subr.bf16.mxu0 %v548_v0  ;;  %398 = vmatprep.subr.bf16.mxu1 %v548_v0 }
  0x4a   :  { %379 = vmatpush3.bf16.msra.mxu0 %v423_v10  ;;  %399 = vmatpush3.bf16.msra.mxu1 %v431_v20 }
  0x4b   :  { %380 = vmatprep.subr.bf16.mxu0 %v548_v0  ;;  %400 = vmatprep.subr.bf16.mxu1 %v548_v0 }
  0x4e   :  { %381 = vmatpush3.bf16.msra.mxu0 %v424_v14  ;;  %401 = vmatpush3.bf16.msra.mxu1 %v432_v22 }
  0x4f   :  { %382 = vmatprep.subr.bf16.mxu0 %v548_v0  ;;  %402 = vmatprep.subr.bf16.mxu1 %v548_v0 }
  0x52   :  { %383 = vmatpush3.bf16.msra.mxu0 %v425_v19  ;;  %403 = vmatpush3.bf16.msra.mxu1 %v433_v23 }
  0x55   :  { %385 = vmatmul.mubr.msk.bf16.vlgmr.msra.gmra.mxu0 %vm338_vm3, %v339_v21 }
 0x115   :  { %v192_v25 = vpop.f32.mrf.mxu0 }
 0x116   :  { %v193_v26 = vadd.f32 %v329_v24, %v192_v25 }
 0x117   :  { %v386_v27 = vpop.f32.mrf.mxu0 }
 0x118   :  { %v198_v28 = vmax.f32 %v193_v26, 0.0 }
 0x119   :  { %v195_v29 = vpop.f32.mrf.mxu0 }
 0x11a   :  { %v199_v30 = vpack.c.bf16 %v198_v28, %v198_v28 }
 0x11b   :  { %v387_v31 = vpop.f32.mrf.mxu0 }
 0x11c   :  { %405 = vmatmul.mubr.bf16.vlgmr.msra.gmra.mxu1 %v199_v30 }
 0x1dc   :  { %v305_v33 = vpop.f32.mrf.mxu1 }
 0x1dd   :  { %v306_v34 = vadd.f32 %v341_v32, %v305_v33 }
 0x1de   :  { %v406_v35 = vpop.f32.mrf.mxu1 }
 0x1df   :  { %311 = vst [vmem:[#allocation10] sm:$0xff] %v306_v34 }
 0x1e0   :  { %v308_v36 = vpop.f32.mrf.mxu1 }
 0x1e1   :  { %525 = shalt.err (!%p522_p10)
}
 0x1e2   :  { %321 = dma.vmem_to_hbm [thread:$0]  %s319_s20, 128, %s614_s6, [#allocation4]   ;;  %v407_v37 = vpop.f32.mrf.mxu1 }
 0x1e3   :  { %540 = dma.done.wait [#allocation4], 128  }
 0x1e4   :  { %541 = vsyncadd [#allocation4], 4294967168 }
 0x1e5   :  { %325 = vsyncpa [#allocation3], 1 }
 0x1e6   :  { %326 = vsyncpa [#allocation6], 1 }
 0x1e7   :  { %327 = vsyncpa [#allocation9], 1 }
 0x1e8   :  { %328 = vsyncpa [#allocation4], 1 }

</bundles_post_ra>
